<compile_context>
chip_gen: v5e
topology: v5e:2x2
jax: 0.10.0
libtpu: 0.0.40
codegen_flags: <defaults>
</compile_context>

<pallas_src>
import functools

import jax
import jax.numpy as jnp
import numpy as np
from jax.experimental import pallas as pl
from jax.experimental.pallas import tpu as pltpu


def bsa_kernel(x_ref, w_ref, out_ref, *, L):
    """One lane tile = NB whole batch elements flattened along the lane axis.

    x_ref:   (C+1, NB*L)  rows [0:C) = x channels, row C = ones (bias fold)
    w_ref:   (3C,  C+1)   rows [0:C)=[Wk|bk], [C:2C)=[Wv|bv], [2C:3C)=[Wc|bc]
    out_ref: (C,   NB*L)
    """
    C = x_ref.shape[0] - 1
    NL = x_ref.shape[1]
    NB = NL // L

    x = x_ref[...]                          # (C+1, NB*L)
    w = w_ref[...]                          # (3C, C+1)

    # k and v projections fused into one MXU matmul over the whole lane tile;
    # bk/bv are folded in via the ones row of x.
    kv = jnp.dot(w[:2 * C], x, preferred_element_type=jnp.float32)   # (2C, NB*L)
    k = kv[:C]                              # (C, NB*L)
    u = jnp.maximum(kv[C:], 0.0)            # relu(v(x)), (C, NB*L)

    wc = w[2 * C:, :C]                      # (C, C)
    bc = w[2 * C:, C:]                      # (C, 1)
    inv_l = 1.0 / float(L)                  # L is a power of two -> exact

    # Per-(batch, channel) mean over L. Batch segments are 128-lane aligned
    # static slices of the flat lane axis, so each slice / XLU reduce / final
    # 1x1-conv matmul / store below is full-width and unmasked.
    for b in range(NB):                     # static unroll, NB is small
        lo, hi = b * L, (b + 1) * L
        u_b = u[:, lo:hi]                   # (C, L)
        k_b = k[:, lo:hi]                   # (C, L)
        tk_b = jnp.sum(u_b * k_b + u_b, axis=-1, keepdims=True) * inv_l   # (C, 1)
        attn_b = tk_b * u_b                 # (C, L)
        out_b = jnp.dot(wc, attn_b, preferred_element_type=jnp.float32) + bc
        out_ref[:, lo:hi] = out_b.astype(out_ref.dtype)


def pack_params(Wk, bk, Wv, bv, Wc, bc):
    """Pack the 6 live parameter tensors into a single (3C, C+1) slab."""
    w = jnp.concatenate([Wk, Wv, Wc], axis=0)                     # (3C, C)
    b = jnp.concatenate([bk, bv, bc], axis=0)[:, None]            # (3C, 1)
    return jnp.concatenate([w, b], axis=1)                        # (3C, C+1)


def bsa_forward(x, w_pack, *, batch_tile=None):
    B, C, L = x.shape
    assert w_pack.shape == (3 * C, C + 1)

    if batch_tile is None:
        # One grid step for small problems; once B grows, take the smallest
        # batch group giving >= 1024 lanes per tile (the kernel is launch/DMA
        # bound, not compute bound, at these sizes).
        batch_tile = B
        for d in range(1, B + 1):
            if B % d == 0 and d * L >= 1024:
                batch_tile = d
                break
    assert B % batch_tile == 0
    num_tiles = B // batch_tile
    NL = batch_tile * L
    # TODO(synk): when C/L grow, size NL so (x tile + out tile + kv) * 2 double
    # buffers stays well under scoped VMEM; halve the v6e choice on v7x (64 MiB).

    # Layout plumbing outside the kernel: flatten batch into the lane axis and
    # append a ones row so the k/v biases fold into the MXU contraction.
    x_flat = jnp.transpose(x, (1, 0, 2)).reshape(C, B * L)
    x_aug = jnp.concatenate([x_flat, jnp.ones((1, B * L), x.dtype)], axis=0)

    out_flat = pl.pallas_call(
        functools.partial(bsa_kernel, L=L),
        out_shape=jax.ShapeDtypeStruct((C, B * L), jnp.float32),
        grid=(num_tiles,),
        in_specs=[
            pl.BlockSpec((C + 1, NL), lambda g: (0, g)),
            pl.BlockSpec((3 * C, C + 1), lambda g: (0, 0)),
        ],
        out_specs=pl.BlockSpec((C, NL), lambda g: (0, g)),
        compiler_params=pltpu.CompilerParams(
            dimension_semantics=("parallel",) if num_tiles > 1 else ("arbitrary",)),
    )(x_aug, w_pack)

    return jnp.transpose(out_flat.reshape(C, B, L), (1, 0, 2))


def bsa_reference(x, Wq, bq, Wk, bk, Wv, bv, Wc, bc):
    """Pure-JAX reference matching the PyTorch forward exactly."""
    hi = jax.lax.Precision.HIGHEST

    def conv1x1(inp, W, b):
        return jnp.einsum("oi,bil->bol", W, inp, precision=hi) + b[None, :, None]

    t = jax.nn.softmax(jnp.mean(conv1x1(x, Wq, bq), axis=1, keepdims=True), axis=-1)
    del t  # computed but unused in the PyTorch forward
    k = conv1x1(x, Wk, bk)
    u = jax.nn.relu(conv1x1(x, Wv, bv))
    tk = jnp.mean(u * k + u, axis=-1, keepdims=True)
    attn = tk * u
    return conv1x1(attn, Wc, bc)


if __name__ == "__main__":
    B, C, L = 2, 8, 128

    key = jax.random.PRNGKey(0)
    ks = jax.random.split(key, 9)
    Wq = 0.3 * jax.random.normal(ks[0], (C, C), jnp.float32)
    bq = 0.1 * jax.random.normal(ks[1], (C,), jnp.float32)
    Wk = 0.3 * jax.random.normal(ks[2], (C, C), jnp.float32)
    bk = 0.1 * jax.random.normal(ks[3], (C,), jnp.float32)
    Wv = 0.3 * jax.random.normal(ks[4], (C, C), jnp.float32)
    bv = 0.1 * jax.random.normal(ks[5], (C,), jnp.float32)
    Wc = 0.3 * jax.random.normal(ks[6], (C, C), jnp.float32)
    bc = 0.1 * jax.random.normal(ks[7], (C,), jnp.float32)
    x = jax.random.normal(ks[8], (B, C, L), jnp.float32)

    w_pack = pack_params(Wk, bk, Wv, bv, Wc, bc)
    out = jax.block_until_ready(bsa_forward(x, w_pack))
    ref = bsa_reference(x, Wq, bq, Wk, bk, Wv, bv, Wc, bc)
    np.testing.assert_allclose(np.asarray(out), np.asarray(ref), atol=1e-4, rtol=1e-4)
    print("KERNEL_OK")
</pallas_src>

<mosaic_0001>
module attributes {stable_mosaic.version = 11 : i64} {
  func.func @bsa_kernel(%arg0: i32, %arg1: memref<9x256xf32, #tpu.memory_space<vmem>>, %arg2: memref<24x9xf32, #tpu.memory_space<vmem>>, %arg3: memref<8x256xf32, #tpu.memory_space<vmem>>) attributes {dimension_semantics = [#tpu.dimension_semantics<arbitrary>], iteration_bounds = array<i64: 1>, scalar_prefetch = 0 : i64, scratch_operands = 0 : i64, tpu.core_type = #tpu.core_type<tc>, window_params = [{transform_indices = @transform_0, window_bounds = array<i64: 9, 256>}, {pipeline_mode = #tpu.pipeline_mode<synchronous>, transform_indices = @transform_1, window_bounds = array<i64: 24, 9>}, {transform_indices = @transform_2, window_bounds = array<i64: 8, 256>}]} {
    %c0 = arith.constant 0 : index
    %c0_0 = arith.constant 0 : index
    %0 = vector.load %arg1[%c0, %c0_0] : memref<9x256xf32, #tpu.memory_space<vmem>>, vector<9x256xf32>
    %c0_1 = arith.constant 0 : index
    %c0_2 = arith.constant 0 : index
    %1 = vector.load %arg2[%c0_1, %c0_2] : memref<24x9xf32, #tpu.memory_space<vmem>>, vector<24x9xf32>
    %2 = vector.extract_strided_slice %1 {offsets = [0, 0], sizes = [16, 9], strides = [1, 1]} : vector<24x9xf32> to vector<16x9xf32>
    %cst = arith.constant dense<0.000000e+00> : vector<16x256xf32>
    %3 = tpu.matmul %2, %0, %cst {dimension_numbers = #tpu.dot_dimension_numbers<[1], [0], [0], [1], [0, 0, 1, 1], [], []>} : vector<16x9xf32>, vector<9x256xf32>, vector<16x256xf32> -> vector<16x256xf32>
    %4 = vector.extract_strided_slice %3 {offsets = [0, 0], sizes = [8, 256], strides = [1, 1]} : vector<16x256xf32> to vector<8x256xf32>
    %5 = vector.extract_strided_slice %3 {offsets = [8, 0], sizes = [8, 256], strides = [1, 1]} : vector<16x256xf32> to vector<8x256xf32>
    %cst_3 = arith.constant 0.000000e+00 : f32
    %6 = vector.broadcast %cst_3 : f32 to vector<8x256xf32>
    %7 = arith.maximumf %5, %6 : vector<8x256xf32>
    %8 = vector.extract_strided_slice %1 {offsets = [16, 0], sizes = [8, 8], strides = [1, 1]} : vector<24x9xf32> to vector<8x8xf32>
    %9 = vector.extract_strided_slice %1 {offsets = [16, 8], sizes = [8, 1], strides = [1, 1]} : vector<24x9xf32> to vector<8x1xf32>
    %10 = vector.extract_strided_slice %7 {offsets = [0, 0], sizes = [8, 128], strides = [1, 1]} : vector<8x256xf32> to vector<8x128xf32>
    %11 = vector.extract_strided_slice %4 {offsets = [0, 0], sizes = [8, 128], strides = [1, 1]} : vector<8x256xf32> to vector<8x128xf32>
    %12 = arith.mulf %10, %11 : vector<8x128xf32>
    %13 = arith.addf %12, %10 : vector<8x128xf32>
    %cst_4 = arith.constant dense<0.000000e+00> : vector<8xf32>
    %14 = vector.multi_reduction <add>, %13, %cst_4 [1] : vector<8x128xf32> to vector<8xf32>
    %15 = vector.shape_cast %14 : vector<8xf32> to vector<8x1xf32>
    %cst_5 = arith.constant 7.812500e-03 : f32
    %16 = vector.broadcast %cst_5 : f32 to vector<8x1xf32>
    %17 = arith.mulf %15, %16 : vector<8x1xf32>
    %18 = vector.broadcast %17 : vector<8x1xf32> to vector<8x128xf32>
    %19 = arith.mulf %18, %10 : vector<8x128xf32>
    %cst_6 = arith.constant dense<0.000000e+00> : vector<8x128xf32>
    %20 = tpu.matmul %8, %19, %cst_6 {dimension_numbers = #tpu.dot_dimension_numbers<[1], [0], [0], [1], [0, 0, 1, 1], [], []>} : vector<8x8xf32>, vector<8x128xf32>, vector<8x128xf32> -> vector<8x128xf32>
    %21 = vector.broadcast %9 : vector<8x1xf32> to vector<8x128xf32>
    %22 = arith.addf %20, %21 : vector<8x128xf32>
    %c0_7 = arith.constant 0 : index
    %c0_8 = arith.constant 0 : index
    %23 = vector.load %arg3[%c0_7, %c0_8] : memref<8x256xf32, #tpu.memory_space<vmem>>, vector<8x128xf32>
    tpu.vector_store %arg3[%c0_7, %c0_8], %22 {strides = array<i32>} : memref<8x256xf32, #tpu.memory_space<vmem>>, vector<8x128xf32>,
    %24 = vector.extract_strided_slice %7 {offsets = [0, 128], sizes = [8, 128], strides = [1, 1]} : vector<8x256xf32> to vector<8x128xf32>
    %25 = vector.extract_strided_slice %4 {offsets = [0, 128], sizes = [8, 128], strides = [1, 1]} : vector<8x256xf32> to vector<8x128xf32>
    %26 = arith.mulf %24, %25 : vector<8x128xf32>
    %27 = arith.addf %26, %24 : vector<8x128xf32>
    %cst_9 = arith.constant dense<0.000000e+00> : vector<8xf32>
    %28 = vector.multi_reduction <add>, %27, %cst_9 [1] : vector<8x128xf32> to vector<8xf32>
    %29 = vector.shape_cast %28 : vector<8xf32> to vector<8x1xf32>
    %cst_10 = arith.constant 7.812500e-03 : f32
    %30 = vector.broadcast %cst_10 : f32 to vector<8x1xf32>
    %31 = arith.mulf %29, %30 : vector<8x1xf32>
    %32 = vector.broadcast %31 : vector<8x1xf32> to vector<8x128xf32>
    %33 = arith.mulf %32, %24 : vector<8x128xf32>
    %cst_11 = arith.constant dense<0.000000e+00> : vector<8x128xf32>
    %34 = tpu.matmul %8, %33, %cst_11 {dimension_numbers = #tpu.dot_dimension_numbers<[1], [0], [0], [1], [0, 0, 1, 1], [], []>} : vector<8x8xf32>, vector<8x128xf32>, vector<8x128xf32> -> vector<8x128xf32>
    %35 = vector.broadcast %9 : vector<8x1xf32> to vector<8x128xf32>
    %36 = arith.addf %34, %35 : vector<8x128xf32>
    %c0_12 = arith.constant 0 : index
    %c128 = arith.constant 128 : index
    %37 = vector.load %arg3[%c0_12, %c128] : memref<8x256xf32, #tpu.memory_space<vmem>>, vector<8x128xf32>
    tpu.vector_store %arg3[%c0_12, %c128], %36 {strides = array<i32>} : memref<8x256xf32, #tpu.memory_space<vmem>>, vector<8x128xf32>,
    return
  }
  func.func @transform_0(%arg0: i32) -> (i32, i32) {
    %c0_i32 = arith.constant 0 : i32
    %c0_i32_0 = arith.constant 0 : i32
    return %c0_i32, %arg0 : i32, i32
  }
  func.func @transform_1(%arg0: i32) -> (i32, i32) {
    %c0_i32 = arith.constant 0 : i32
    %c0_i32_0 = arith.constant 0 : i32
    %c0_i32_1 = arith.constant 0 : i32
    return %c0_i32, %c0_i32_0 : i32, i32
  }
  func.func @transform_2(%arg0: i32) -> (i32, i32) {
    %c0_i32 = arith.constant 0 : i32
    %c0_i32_0 = arith.constant 0 : i32
    return %c0_i32, %arg0 : i32, i32
  }
}

</mosaic_0001>

<bundles_post_ra>
// kernel: tpu_custom_call.1
= control target key start
LH: loop header
LB: loop body
LE: loop exit
PB: predicated region body
PF: predicated region fallthrough
CT: control target
= control target key end

     0   :  { %vm26_vm0 = vcmask 1040384   ;;  %vm19_vm1 = vcmask 72704   ;;  %s238_s0 = inlined_call_operand.vmem [shape: f32[9,256], index: 0, kind: input, shape index: {}]   ;;  %s239_s1 = inlined_call_operand.vmem [shape: f32[24,9], index: 1, kind: input, shape index: {}]   ;;  %s240_s2 = inlined_call_operand.hbm [shape: f32[8,256], index: 2, kind: output, shape index: {}]  }
   0x1   :  { %v14_v0 = vld [vmem:[%s238_s0 + $0x10] sm:$0x1]  ;;  %v15_v1 = vld [vmem:[%s238_s0 + $0x18] sm:$0x1]  ;;  %v12_v2 = vld [vmem:[%s238_s0] sm:$0xff] }
   0x2   :  { %159 = vmatpush.msk.msra.mxu0 %vm26_vm0, %v14_v0  ;;  %162 = vmatpush.msk.msra.mxu1 %vm26_vm0, %v15_v1  ;;  %v13_v3 = vld [vmem:[%s238_s0 + $0x8] sm:$0xff]  ;;  %v16_v4 = vld [vmem:[%s239_s1] sm:$0xff] }
   0x3   :  { %7 = vsyncpa [#allocation3], 0  ;;  %v17_v5 = vld [vmem:[%s239_s1 + $0x8] sm:$0xff]  ;;  %v18_v16 = vld [vmem:[%s239_s1 + $0x10] sm:$0xff]  ;;  %v197_v17 = vmov 8   ;;  %vm92_vm2 = vcmask 64512  }
   0x4   :  { %48 = vmatpush.msra.mxu0 %v12_v2  ;;  %71 = vmatpush.msra.mxu1 %v13_v3  ;;  %s198_s1 = smov [#allocation2]   ;;  %s150_s25 = sshll.u32 %s240_s2, 4  ;;  %s151_s25 = int_to_ptr.hbm [resolvable:$true] %s150_s25 }
   0x5   :  { %160 = vmatmul.msk.f32.vlgmr.msra.gmra.mxu0 %vm19_vm1, %v16_v4  ;;  %163 = vmatmul.msk.f32.vlgmr.msra.gmra.mxu1 %vm19_vm1, %v16_v4  ;;  %s148_s22 = sshll.u32 %s198_s1, 4  ;;  %s149_s22 = int_to_ptr.vmem [resolvable:$true] %s148_s22 }
   0x6   :  { %169 = vset.pattern.permute.xlu1 %v197_v17  ;;  %170 = vset.pattern.permute.xlu0 %v197_v17 }
   0x7   :  { %89 = vperm.xlu1 %169, %v18_v16  }
   0xd   :  { %161 = vmatmul.msk.f32.gmra.mxu0 %vm19_vm1, %v17_v5  ;;  %164 = vmatmul.msk.f32.gmra.mxu1 %vm19_vm1, %v17_v5 }
  0x79   :  { %v90_v24 = vpop.permute.xlu1 %89 }
  0x82   :  { %v50_v6 = vpop.f32.mrf.mxu0  ;;  %v73_v7 = vpop.f32.mrf.mxu1 }
  0x8a   :  { %v53_v8 = vpop.f32.mrf.mxu0  ;;  %v76_v10 = vpop.f32.mrf.mxu1 }
  0x8b   :  { %v79_v9 = vmax.f32 %v53_v8, 0.0  ;;  %v80_v12 = vmax.f32 %v76_v10, 0.0 }
  0x8d   :  { %v81_v11 = vmul.f32 %v79_v9, %v50_v6  ;;  %v116_v14 = vmul.f32 %v80_v12, %v73_v7 }
  0x8f   :  { %v82_v13 = vadd.f32 %v81_v11, %v79_v9  ;;  %v117_v15 = vadd.f32 %v116_v14, %v80_v12 }
  0x91   :  { %83 = vadd.xlane.f32.xlu0 %v82_v13 }
  0x99   :  { %118 = vadd.xlane.f32.xlu0 %v117_v15 }
 0x104   :  { %v84_v18 = vpop.xlane.xlu0 %83 }
 0x105   :  { %v85_v19 = vmul.f32 0.0078125, %v84_v18 }
 0x107   :  { %v86_v20 = vmul.f32 %v85_v19, %v79_v9 }
 0x109   :  { %110 = vmatpush.msra.mxu2 %v86_v20 }
 0x10a   :  { %165 = vmatmul.msk.f32.vlgmr.msra.gmra.mxu2 %vm92_vm2, %v18_v16 }
 0x10c   :  { %v119_v21 = vpop.xlane.xlu0 %118 }
 0x10d   :  { %v120_v22 = vmul.f32 0.0078125, %v119_v21 }
 0x10f   :  { %v121_v23 = vmul.f32 %v120_v22, %v80_v12 }
 0x111   :  { %137 = vmatpush.msra.mxu3 %v121_v23 }
 0x112   :  { %166 = vmatmul.msk.f32.vlgmr.msra.gmra.mxu3 %vm92_vm2, %v18_v16 }
 0x18d   :  { %v112_v25 = vpop.f32.mrf.mxu2 }
 0x18e   :  { %v113_v26 = vadd.f32 %v112_v25, %v90_v24 }
 0x190   :  { %115 = vst [vmem:[#allocation2] sm:$0xff] %v113_v26 }
 0x195   :  { %v139_v27 = vpop.f32.mrf.mxu3 }
 0x196   :  { %v140_v28 = vadd.f32 %v139_v27, %v90_v24 }
 0x198   :  { %142 = vst [vmem:[#allocation2 + $0x8] sm:$0xff] %v140_v28 }
 0x199   :  { %153 = dma.vmem_to_hbm [thread:$0]  %s149_s22, 256, %s151_s25, [#allocation3]  }
 0x19a   :  { %195 = dma.done.wait [#allocation3], 256  }
 0x19b   :  { %196 = vsyncadd [#allocation3], 4294967040 }
 0x19c   :  { %158 = vsyncpa [#allocation3], 1 }

</bundles_post_ra>
